<compile_context>
chip_gen: v7x
topology: tpu7x:2x2x1
jax: 0.10.0
libtpu: 0.0.40
codegen_flags: <defaults>
</compile_context>

<pallas_src>
import jax
import jax.numpy as jnp
from jax.experimental import pallas as pl
from jax.experimental.pallas import tpu as pltpu


def _round_up(x, m):
    return ((x + m - 1) // m) * m


def mlp_kernel(x_ref, w1_ref, b1_ref, wi_ref, bi_ref,
               meaning_ref, lang_ref, iden_ref):
    x = x_ref[...]
    # Fused first layer: one MXU pass produces [meaning | lang] side by side.
    fused = jnp.dot(x, w1_ref[...], preferred_element_type=jnp.float32) + b1_ref[...]
    e_pad = meaning_ref.shape[1]                 # 128-aligned split point
    meaning = fused[:, :e_pad]
    lang = fused[:, e_pad:]
    # Second layer chained on the in-VMEM lang activations.
    iden = jnp.dot(lang, wi_ref[...], preferred_element_type=jnp.float32) + bi_ref[...]
    meaning_ref[...] = meaning.astype(meaning_ref.dtype)
    lang_ref[...] = lang.astype(lang_ref.dtype)
    iden_ref[...] = iden.astype(iden_ref.dtype)


def mlp_forward(x, wm, bm, wl, bl, wi, bi):
    """x: (B, E); wm/wl: (E, E); wi: (E, L); biases: (1, out).

    Weights are in (in_features, out_features) layout (i.e. PyTorch
    nn.Linear weight transposed) so the hot path is a plain x @ W + b.
    Returns (meaning_emb (B,E), lang_emb (B,E), lang_iden (B,L)).
    """
    B, E = x.shape
    L = wi.shape[1]
    dtype = x.dtype

    # --- pad feature dims to 128 lanes (lane-dense stores) -------------------
    E_pad = _round_up(E, 128)
    L_pad = _round_up(L, 128)

    # --- batch tiling ---------------------------------------------------------
    TB = min(128, _round_up(B, 8))
    B_pad = _round_up(B, TB)
    num_blocks = B_pad // TB

    # Zero-pad activations / weights / biases (zeros keep the math exact).
    x_p = jnp.zeros((B_pad, E_pad), dtype).at[:B, :E].set(x)

    # Fused first-layer weight [Wm | Wl] and bias [bm | bl].
    w1 = jnp.zeros((E_pad, 2 * E_pad), dtype)
    w1 = w1.at[:E, :E].set(wm).at[:E, E_pad:E_pad + E].set(wl)
    b1 = jnp.zeros((1, 2 * E_pad), dtype)
    b1 = b1.at[:, :E].set(bm).at[:, E_pad:E_pad + E].set(bl)

    wi_p = jnp.zeros((E_pad, L_pad), dtype).at[:E, :L].set(wi)
    bi_p = jnp.zeros((1, L_pad), dtype).at[:, :L].set(bi)

    const = lambda shape: pl.BlockSpec(shape, lambda i: tuple(0 for _ in shape))

    meaning_p, lang_p, iden_p = pl.pallas_call(
        mlp_kernel,
        grid=(num_blocks,),
        out_shape=(
            jax.ShapeDtypeStruct((B_pad, E_pad), dtype),   # meaning_emb
            jax.ShapeDtypeStruct((B_pad, E_pad), dtype),   # lang_emb
            jax.ShapeDtypeStruct((B_pad, L_pad), dtype),   # lang_iden
        ),
        in_specs=[
            pl.BlockSpec((TB, E_pad), lambda i: (i, 0)),   # x: tiled over batch
            const((E_pad, 2 * E_pad)),                     # fused W1 (resident)
            const((1, 2 * E_pad)),                         # fused b1 (resident)
            const((E_pad, L_pad)),                         # Wi (resident)
            const((1, L_pad)),                             # bi (resident)
        ],
        out_specs=(
            pl.BlockSpec((TB, E_pad), lambda i: (i, 0)),
            pl.BlockSpec((TB, E_pad), lambda i: (i, 0)),
            pl.BlockSpec((TB, L_pad), lambda i: (i, 0)),
        ),
        compiler_params=pltpu.CompilerParams(
            dimension_semantics=("parallel",),
        ),
    )(x_p, w1, b1, wi_p, bi_p)

    # Strip padding outside the kernel.
    return (meaning_p[:B, :E], lang_p[:B, :E], iden_p[:B, :L])


if __name__ == "__main__":
    # Small shapes consistent with the module: emb_size -> 32, lang_num = 7.
    B, E, L = 8, 32, 7
    key = jax.random.PRNGKey(0)
    kx, k1, k2, k3, k4, k5, k6 = jax.random.split(key, 7)

    x = jax.random.normal(kx, (B, E), dtype=jnp.float32)
    # Parameters in (in, out) layout (transposed nn.Linear weights).
    wm = jax.random.normal(k1, (E, E), dtype=jnp.float32) * 0.02
    bm = jax.random.normal(k2, (1, E), dtype=jnp.float32) * 0.02
    wl = jax.random.normal(k3, (E, E), dtype=jnp.float32) * 0.02
    bl = jax.random.normal(k4, (1, E), dtype=jnp.float32) * 0.02
    wi = jax.random.normal(k5, (E, L), dtype=jnp.float32) * 0.02
    bi = jax.random.normal(k6, (1, L), dtype=jnp.float32) * 0.02

    meaning, lang, iden = jax.block_until_ready(
        mlp_forward(x, wm, bm, wl, bl, wi, bi)
    )

    # Reference check against plain JAX (same semantics as PyTorch Linear).
    ref_meaning = x @ wm + bm
    ref_lang = x @ wl + bl
    ref_iden = ref_lang @ wi + bi
    assert meaning.shape == (B, E) and lang.shape == (B, E) and iden.shape == (B, L)
    assert jnp.allclose(meaning, ref_meaning, atol=1e-5)
    assert jnp.allclose(lang, ref_lang, atol=1e-5)
    assert jnp.allclose(iden, ref_iden, atol=1e-5)

    print("KERNEL_OK")
</pallas_src>

<mosaic_0001>
module attributes {stable_mosaic.version = 11 : i64} {
  func.func @mlp_kernel(%arg0: i32, %arg1: memref<8x128xf32, #tpu.memory_space<vmem>>, %arg2: memref<128x256xf32, #tpu.memory_space<vmem>>, %arg3: memref<1x256xf32, #tpu.memory_space<vmem>>, %arg4: memref<128x128xf32, #tpu.memory_space<vmem>>, %arg5: memref<1x128xf32, #tpu.memory_space<vmem>>, %arg6: memref<8x128xf32, #tpu.memory_space<vmem>>, %arg7: memref<8x128xf32, #tpu.memory_space<vmem>>, %arg8: memref<8x128xf32, #tpu.memory_space<vmem>>) attributes {dimension_semantics = [#tpu.dimension_semantics<parallel>], iteration_bounds = array<i64: 1>, scalar_prefetch = 0 : i64, scratch_operands = 0 : i64, tpu.core_type = #tpu.core_type<tc>, window_params = [{transform_indices = @transform_0, window_bounds = array<i64: 8, 128>}, {pipeline_mode = #tpu.pipeline_mode<synchronous>, transform_indices = @transform_1, window_bounds = array<i64: 128, 256>}, {pipeline_mode = #tpu.pipeline_mode<synchronous>, transform_indices = @transform_2, window_bounds = array<i64: 1, 256>}, {pipeline_mode = #tpu.pipeline_mode<synchronous>, transform_indices = @transform_3, window_bounds = array<i64: 128, 128>}, {pipeline_mode = #tpu.pipeline_mode<synchronous>, transform_indices = @transform_4, window_bounds = array<i64: 1, 128>}, {transform_indices = @transform_5, window_bounds = array<i64: 8, 128>}, {transform_indices = @transform_6, window_bounds = array<i64: 8, 128>}, {transform_indices = @transform_7, window_bounds = array<i64: 8, 128>}]} {
    %c0 = arith.constant 0 : index
    %c0_0 = arith.constant 0 : index
    %0 = vector.load %arg1[%c0, %c0_0] : memref<8x128xf32, #tpu.memory_space<vmem>>, vector<8x128xf32>
    %c0_1 = arith.constant 0 : index
    %c0_2 = arith.constant 0 : index
    %1 = vector.load %arg2[%c0_1, %c0_2] : memref<128x256xf32, #tpu.memory_space<vmem>>, vector<128x256xf32>
    %cst = arith.constant dense<0.000000e+00> : vector<8x256xf32>
    %2 = tpu.matmul %0, %1, %cst {dimension_numbers = #tpu.dot_dimension_numbers<[1], [0], [0], [1], [0, 0, 1, 1], [], []>} : vector<8x128xf32>, vector<128x256xf32>, vector<8x256xf32> -> vector<8x256xf32>
    %c0_3 = arith.constant 0 : index
    %c0_4 = arith.constant 0 : index
    %3 = vector.load %arg3[%c0_3, %c0_4] : memref<1x256xf32, #tpu.memory_space<vmem>>, vector<1x256xf32>
    %4 = vector.broadcast %3 : vector<1x256xf32> to vector<8x256xf32>
    %5 = arith.addf %2, %4 : vector<8x256xf32>
    %6 = vector.extract_strided_slice %5 {offsets = [0, 0], sizes = [8, 128], strides = [1, 1]} : vector<8x256xf32> to vector<8x128xf32>
    %7 = vector.extract_strided_slice %5 {offsets = [0, 128], sizes = [8, 128], strides = [1, 1]} : vector<8x256xf32> to vector<8x128xf32>
    %c0_5 = arith.constant 0 : index
    %c0_6 = arith.constant 0 : index
    %8 = vector.load %arg4[%c0_5, %c0_6] : memref<128x128xf32, #tpu.memory_space<vmem>>, vector<128x128xf32>
    %cst_7 = arith.constant dense<0.000000e+00> : vector<8x128xf32>
    %9 = tpu.matmul %7, %8, %cst_7 {dimension_numbers = #tpu.dot_dimension_numbers<[1], [0], [0], [1], [0, 0, 1, 1], [], []>} : vector<8x128xf32>, vector<128x128xf32>, vector<8x128xf32> -> vector<8x128xf32>
    %c0_8 = arith.constant 0 : index
    %c0_9 = arith.constant 0 : index
    %10 = vector.load %arg5[%c0_8, %c0_9] : memref<1x128xf32, #tpu.memory_space<vmem>>, vector<1x128xf32>
    %11 = vector.broadcast %10 : vector<1x128xf32> to vector<8x128xf32>
    %12 = arith.addf %9, %11 : vector<8x128xf32>
    %c0_10 = arith.constant 0 : index
    %c0_11 = arith.constant 0 : index
    %13 = vector.load %arg6[%c0_10, %c0_11] : memref<8x128xf32, #tpu.memory_space<vmem>>, vector<8x128xf32>
    tpu.vector_store %arg6[%c0_10, %c0_11], %6 {strides = array<i32>} : memref<8x128xf32, #tpu.memory_space<vmem>>, vector<8x128xf32>,
    %c0_12 = arith.constant 0 : index
    %c0_13 = arith.constant 0 : index
    %14 = vector.load %arg7[%c0_12, %c0_13] : memref<8x128xf32, #tpu.memory_space<vmem>>, vector<8x128xf32>
    tpu.vector_store %arg7[%c0_12, %c0_13], %7 {strides = array<i32>} : memref<8x128xf32, #tpu.memory_space<vmem>>, vector<8x128xf32>,
    %c0_14 = arith.constant 0 : index
    %c0_15 = arith.constant 0 : index
    %15 = vector.load %arg8[%c0_14, %c0_15] : memref<8x128xf32, #tpu.memory_space<vmem>>, vector<8x128xf32>
    tpu.vector_store %arg8[%c0_14, %c0_15], %12 {strides = array<i32>} : memref<8x128xf32, #tpu.memory_space<vmem>>, vector<8x128xf32>,
    return
  }
  func.func @transform_0(%arg0: i32) -> (i32, i32) {
    %c0_i32 = arith.constant 0 : i32
    %c0_i32_0 = arith.constant 0 : i32
    return %arg0, %c0_i32 : i32, i32
  }
  func.func @transform_1(%arg0: i32) -> (i32, i32) {
    %c0_i32 = arith.constant 0 : i32
    %c0_i32_0 = arith.constant 0 : i32
    %c0_i32_1 = arith.constant 0 : i32
    return %c0_i32, %c0_i32_0 : i32, i32
  }
  func.func @transform_2(%arg0: i32) -> (i32, i32) {
    %c0_i32 = arith.constant 0 : i32
    %c0_i32_0 = arith.constant 0 : i32
    %c0_i32_1 = arith.constant 0 : i32
    return %c0_i32, %c0_i32_0 : i32, i32
  }
  func.func @transform_3(%arg0: i32) -> (i32, i32) {
    %c0_i32 = arith.constant 0 : i32
    %c0_i32_0 = arith.constant 0 : i32
    %c0_i32_1 = arith.constant 0 : i32
    return %c0_i32, %c0_i32_0 : i32, i32
  }
  func.func @transform_4(%arg0: i32) -> (i32, i32) {
    %c0_i32 = arith.constant 0 : i32
    %c0_i32_0 = arith.constant 0 : i32
    %c0_i32_1 = arith.constant 0 : i32
    return %c0_i32, %c0_i32_0 : i32, i32
  }
  func.func @transform_5(%arg0: i32) -> (i32, i32) {
    %c0_i32 = arith.constant 0 : i32
    %c0_i32_0 = arith.constant 0 : i32
    return %arg0, %c0_i32 : i32, i32
  }
  func.func @transform_6(%arg0: i32) -> (i32, i32) {
    %c0_i32 = arith.constant 0 : i32
    %c0_i32_0 = arith.constant 0 : i32
    return %arg0, %c0_i32 : i32, i32
  }
  func.func @transform_7(%arg0: i32) -> (i32, i32) {
    %c0_i32 = arith.constant 0 : i32
    %c0_i32_0 = arith.constant 0 : i32
    return %arg0, %c0_i32 : i32, i32
  }
}

</mosaic_0001>

<bundles_post_ra>
// kernel: tpu_custom_call.1
= control target key start
LH: loop header
LB: loop body
LE: loop exit
PB: predicated region body
PF: predicated region fallthrough
CT: control target
= control target key end

     0   :  { %13 = vsyncpa [#allocation3], 0  ;;  %s722_s0 = inlined_call_operand.hbm [shape: f32[8,128], index: 0, kind: input, shape index: {}]   ;;  %s723_s1 = inlined_call_operand.hbm [shape: f32[128,256], index: 1, kind: input, shape index: {}]   ;;  %s724_s2 = inlined_call_operand.vmem [shape: f32[1,256], index: 2, kind: input, shape index: {}]   ;;  %s725_s3 = inlined_call_operand.hbm [shape: f32[128,128], index: 3, kind: input, shape index: {}]   ;;  %s726_s4 = inlined_call_operand.vmem [shape: f32[1,128], index: 4, kind: input, shape index: {}]   ;;  %s727_s5 = inlined_call_operand.hbm [shape: f32[8,128], index: 5, kind: output, shape index: {0}]   ;;  %s728_s6 = inlined_call_operand.hbm [shape: f32[8,128], index: 6, kind: output, shape index: {1}]   ;;  %s729_s7 = inlined_call_operand.hbm [shape: f32[8,128], index: 7, kind: output, shape index: {2}]  }
   0x1   :  { %14 = vsyncpa [#allocation6], 0 }
   0x2   :  { %15 = vsyncpa [#allocation4], 0 }
   0x3   :  { %16 = vsyncpa [#allocation10], 0  ;;  %s581_s24 = smov [#allocation5]   ;;  %s441_s28 = scalar_lea.hbm %s723_s1, 4096 }
   0x4   :  { %s32_s25 = sshll.u32 %s581_s24, 4  ;;  %p442_p0 = scmp.ne.s32.totalorder %s723_s1, %s441_s28  ;;  %s33_s25 = int_to_ptr.vmem [resolvable:$true] %s32_s25 }
   0x5   :  { %p445_p1 = scmp.lt.u32.totalorder %s441_s28, %s723_s1 }
   0x7   :  { %p447_p2 = pnand %p445_p1, %p442_p0 }
   0x9   :  { %450 = shalt.err (!%p447_p2)
}
   0xa   :  { %s451_s10 = scalar_lea.vmem %s33_s25, 4096  ;;  %p456_p4 = scmp.lt.s32.totalorder %s33_s25, %s33_s25 }
   0xb   :  { %p452_p3 = scmp.ne.s32.totalorder %s33_s25, %s451_s10  ;;  %p457_p5 = scmp.lt.s32.totalorder %s451_s10, %s451_s10 }
   0xd   :  { %p458_p6 = por %p457_p5, %p456_p4 }
   0xf   :  { %p459_p7 = pnand %p458_p6, %p452_p3 }
  0x11   :  { %462 = shalt.err (!%p459_p7)
}
  0x12   :  { %s582_s11 = smov 256   ;;  %s583_s12 = smov 16  }
  0x13   :  { %38 = dma.hbm_to_vmem [thread:$0]  %s723_s1, 4096, %s33_s25, [#allocation6], %s582_s11, %s582_s11, %s583_s12  }
  0x14   :  { %s584_s15 = smov [#allocation2]   ;;  %s585_s17 = smov [#allocation7]  }
  0x15   :  { %s23_s16 = sshll.u32 %s584_s15, 4  ;;  %s46_s18 = sshll.u32 %s585_s17, 4  ;;  %s24_s16 = int_to_ptr.vmem [resolvable:$true] %s23_s16  ;;  %s47_s18 = int_to_ptr.vmem [resolvable:$true] %s46_s18 }
  0x16   :  { %s463_s21 = scalar_lea.hbm %s722_s0, 128 }
  0x17   :  { %p464_p8 = scmp.ne.s32.totalorder %s722_s0, %s463_s21  ;;  %p467_p9 = scmp.lt.u32.totalorder %s463_s21, %s722_s0 }
  0x19   :  { %p469_p10 = pnand %p467_p9, %p464_p8 }
  0x1b   :  { %472 = shalt.err (!%p469_p10)
}
  0x1c   :  { %s473_s1 = scalar_lea.vmem %s24_s16, 128  ;;  %p478_p12 = scmp.lt.s32.totalorder %s24_s16, %s24_s16 }
  0x1d   :  { %p474_p11 = scmp.ne.s32.totalorder %s24_s16, %s473_s1  ;;  %p479_p13 = scmp.lt.s32.totalorder %s473_s1, %s473_s1 }
  0x1f   :  { %p480_p0 = por %p479_p13, %p478_p12 }
  0x21   :  { %p481_p1 = pnand %p480_p0, %p474_p11 }
  0x23   :  { %484 = shalt.err (!%p481_p1)
}
  0x24   :  { %26 = dma.hbm_to_vmem [thread:$0]  %s722_s0, 128, %s24_s16, [#allocation3]  }
  0x25   :  { %s485_s30 = scalar_lea.hbm %s725_s3, 2048 }
  0x26   :  { %p486_p2 = scmp.ne.s32.totalorder %s725_s3, %s485_s30  ;;  %p489_p3 = scmp.lt.u32.totalorder %s485_s30, %s725_s3 }
  0x28   :  { %p491_p4 = pnand %p489_p3, %p486_p2 }
  0x2a   :  { %494 = shalt.err (!%p491_p4)
}
  0x2b   :  { %s495_s12 = scalar_lea.vmem %s47_s18, 2048  ;;  %p500_p6 = scmp.lt.s32.totalorder %s47_s18, %s47_s18 }
  0x2c   :  { %p496_p5 = scmp.ne.s32.totalorder %s47_s18, %s495_s12  ;;  %p501_p7 = scmp.lt.s32.totalorder %s495_s12, %s495_s12 }
  0x2e   :  { %p502_p8 = por %p501_p7, %p500_p6 }
  0x30   :  { %p503_p9 = pnand %p502_p8, %p496_p5 }
  0x32   :  { %506 = shalt.err (!%p503_p9)
}
  0x33   :  { %s586_s0 = smov 128   ;;  %s587_s13 = smov 8  }
  0x34   :  { %52 = dma.hbm_to_vmem [thread:$0]  %s725_s3, 2048, %s47_s18, [#allocation6], %s586_s0, %s586_s0, %s587_s13  }
  0x35   :  { %573 = dma.done.wait [#allocation3], 128  }
  0x36   :  { %574 = vsyncadd [#allocation3], 4294967168 }
  0x37   :  { %575 = dma.done.wait [#allocation6], 6144  }
  0x38   :  { %576 = vsyncadd [#allocation6], 4294961152  ;;  %v588_v0 = vmov 0.0   ;;  %v589_v1 = vmov 0.0|0.0   ;;  %v66_v2 = vld [vmem:[#allocation5 + $0x8] sm:$0xff]  ;;  %v68_v3 = vld [vmem:[#allocation5 + $0x18] sm:$0xff] }
  0x39   :  { %173 = vmatprep.mubr.f32.mxu0 %v588_v0  ;;  %404 = vmatprep.subr.bf16.mxu1 %v589_v1  ;;  %v65_v4 = vld [vmem:[#allocation5] sm:$0xff]  ;;  %v372_v5 = vpack.c.bf16 %v68_v3, %v66_v2  ;;  %v67_v6 = vld [vmem:[#allocation5 + $0x10] sm:$0xff]  ;;  %v70_v7 = vld [vmem:[#allocation5 + $0x28] sm:$0xff]  ;;  %vm590_vm0 = vmmov 0   ;;  %s591_s17 = smov [#allocation9]   ;;  %s592_s19 = smov [#allocation8]  }
  0x3a   :  { %v72_v8 = vld [vmem:[#allocation5 + $0x38] sm:$0xff]  ;;  %v374_v9 = vpack.c.bf16 %v67_v6, %v65_v4  ;;  %v69_v11 = vld [vmem:[#allocation5 + $0x20] sm:$0xff]  ;;  %v71_v12 = vld [vmem:[#allocation5 + $0x30] sm:$0xff]  ;;  %369 = vmatprep.mubr.msk.f32.mxu1 %vm590_vm0, %v588_v0  ;;  %s292_s18 = sshll.u32 %s591_s17, 4  ;;  %s282_s20 = sshll.u32 %s592_s19, 4  ;;  %s293_s18 = int_to_ptr.vmem [resolvable:$true] %s292_s18  ;;  %s283_s20 = int_to_ptr.vmem [resolvable:$true] %s282_s20 }
  0x3b   :  { %v376_v10 = vpack.c.bf16 %v72_v8, %v70_v7  ;;  %v74_v13 = vld [vmem:[#allocation5 + $0x48] sm:$0xff]  ;;  %373 = vmatprep.subr.bf16.mxu0 %v372_v5  ;;  %v76_v14 = vld [vmem:[#allocation5 + $0x58] sm:$0xff]  ;;  %v378_v15 = vpack.c.bf16 %v71_v12, %v69_v11  ;;  %v73_v17 = vld [vmem:[#allocation5 + $0x40] sm:$0xff]  ;;  %s507_s21 = scalar_lea.vmem %s293_s18, 128  ;;  %p512_p11 = scmp.lt.s32.totalorder %s293_s18, %s293_s18 }
  0x3c   :  { %375 = vmatpush1.bf16.msra.mxu0 %v374_v9  ;;  %v380_v16 = vpack.c.bf16 %v76_v14, %v74_v13  ;;  %v75_v18 = vld [vmem:[#allocation5 + $0x50] sm:$0xff]  ;;  %v78_v19 = vld [vmem:[#allocation5 + $0x68] sm:$0xff]  ;;  %v80_v20 = vld [vmem:[#allocation5 + $0x78] sm:$0xff]  ;;  %v99_v13 = vlaneseq  ;;  %p508_p10 = scmp.ne.s32.totalorder %s293_s18, %s507_s21  ;;  %p513_p12 = scmp.lt.s32.totalorder %s507_s21, %s507_s21 }
  0x3d   :  { %377 = vmatprep.subr.bf16.mxu0 %v376_v10  ;;  %v382_v21 = vpack.c.bf16 %v75_v18, %v73_v17  ;;  %v384_v22 = vpack.c.bf16 %v80_v20, %v78_v19  ;;  %v77_v23 = vld [vmem:[#allocation5 + $0x60] sm:$0xff]  ;;  %v79_v24 = vld [vmem:[#allocation5 + $0x70] sm:$0xff]  ;;  %v82_v25 = vld [vmem:[#allocation5 + $0x88] sm:$0xff] }
  0x3e   :  { %v84_v26 = vld [vmem:[#allocation5 + $0x98] sm:$0xff]  ;;  %v180_v27 = vld [vmem:[#allocation7] sm:$0xff]  ;;  %v181_v28 = vld [vmem:[#allocation7 + $0x8] sm:$0xff]  ;;  %v386_v30 = vpack.c.bf16 %v79_v24, %v77_v23  ;;  %v100_v14 = vshrl.u32 %v99_v13, 7  ;;  %p514_p13 = por %p513_p12, %p512_p11 }
  0x3f   :  { %v182_v29 = vld [vmem:[#allocation7 + $0x10] sm:$0xff]  ;;  %v405_v31 = vpack.c.bf16 %v181_v28, %v180_v27  ;;  %v183_v32 = vld [vmem:[#allocation7 + $0x18] sm:$0xff]  ;;  %v388_v33 = vpack.c.bf16 %v84_v26, %v82_v25  ;;  %v81_v34 = vld [vmem:[#allocation5 + $0x80] sm:$0xff] }
  0x40   :  { %379 = vmatpush1.bf16.msra.mxu0 %v378_v15  ;;  %v83_v35 = vld [vmem:[#allocation5 + $0x90] sm:$0xff]  ;;  %v86_v36 = vld [vmem:[#allocation5 + $0xa8] sm:$0xff]  ;;  %v88_v37 = vld [vmem:[#allocation5 + $0xb8] sm:$0xff]  ;;  %v408_v38 = vpack.c.bf16 %v183_v32, %v182_v29  ;;  %v101_v15 = vsub.s32 0, %v100_v14  ;;  %v105_v17 = vsub.s32 1, %v100_v14  ;;  %p515_p0 = pnand %p514_p13, %p508_p10 }
  0x41   :  { %381 = vmatprep.subr.bf16.mxu0 %v380_v16  ;;  %406 = vmatpush3.bf16.msra.mxu1 %v405_v31  ;;  %v184_v39 = vld [vmem:[#allocation7 + $0x20] sm:$0xff]  ;;  %v185_v40 = vld [vmem:[#allocation7 + $0x28] sm:$0xff]  ;;  %v390_v41 = vpack.c.bf16 %v83_v35, %v81_v34  ;;  %v392_v42 = vpack.c.bf16 %v88_v37, %v86_v36  ;;  %v87_v44 = vld [vmem:[#allocation5 + $0xb0] sm:$0xff] }
  0x42   :  { %407 = vmatprep.subr.bf16.mxu1 %v589_v1  ;;  %v85_v43 = vld [vmem:[#allocation5 + $0xa0] sm:$0xff]  ;;  %v90_v45 = vld [vmem:[#allocation5 + $0xc8] sm:$0xff]  ;;  %v92_v46 = vld [vmem:[#allocation5 + $0xd8] sm:$0xff]  ;;  %v411_v47 = vpack.c.bf16 %v185_v40, %v184_v39 }
  0x43   :  { %v186_v48 = vld [vmem:[#allocation7 + $0x30] sm:$0xff]  ;;  %v187_v49 = vld [vmem:[#allocation7 + $0x38] sm:$0xff]  ;;  %v394_v50 = vpack.c.bf16 %v87_v44, %v85_v43  ;;  %v396_v51 = vpack.c.bf16 %v92_v46, %v90_v45  ;;  %v89_v52 = vld [vmem:[#allocation5 + $0xc0] sm:$0xff] }
  0x44   :  { %383 = vmatpush1.bf16.msra.mxu0 %v382_v21  ;;  %v91_v53 = vld [vmem:[#allocation5 + $0xd0] sm:$0xff]  ;;  %v94_v54 = vld [vmem:[#allocation5 + $0xe8] sm:$0xff]  ;;  %v96_v55 = vld [vmem:[#allocation5 + $0xf8] sm:$0xff]  ;;  %v414_v56 = vpack.c.bf16 %v187_v49, %v186_v48 }
  0x45   :  { %385 = vmatprep.subr.bf16.mxu0 %v384_v22  ;;  %409 = vmatpush3.bf16.msra.mxu1 %v408_v38  ;;  %v188_v57 = vld [vmem:[#allocation7 + $0x40] sm:$0xff]  ;;  %v189_v58 = vld [vmem:[#allocation7 + $0x48] sm:$0xff]  ;;  %v398_v59 = vpack.c.bf16 %v91_v53, %v89_v52  ;;  %v400_v60 = vpack.c.bf16 %v96_v55, %v94_v54  ;;  %v95_v62 = vld [vmem:[#allocation5 + $0xf0] sm:$0xff] }
  0x46   :  { %410 = vmatprep.subr.bf16.mxu1 %v589_v1  ;;  %v93_v61 = vld [vmem:[#allocation5 + $0xe0] sm:$0xff]  ;;  %v417_v63 = vpack.c.bf16 %v189_v58, %v188_v57  ;;  %v190_v2 = vld [vmem:[#allocation7 + $0x50] sm:$0xff]  ;;  %v191_v3 = vld [vmem:[#allocation7 + $0x58] sm:$0xff] }
  0x47   :  { %v402_v4 = vpack.c.bf16 %v95_v62, %v93_v61  ;;  %v420_v5 = vpack.c.bf16 %v191_v3, %v190_v2  ;;  %v192_v6 = vld [vmem:[#allocation7 + $0x60] sm:$0xff]  ;;  %v193_v7 = vld [vmem:[#allocation7 + $0x68] sm:$0xff]  ;;  %v64_v8 = vld [vmem:[#allocation2] sm:$0xff] }
  0x48   :  { %387 = vmatpush1.bf16.msra.mxu0 %v386_v30  ;;  %v423_v9 = vpack.c.bf16 %v193_v7, %v192_v6  ;;  %v194_v10 = vld [vmem:[#allocation7 + $0x70] sm:$0xff]  ;;  %v195_v11 = vld [vmem:[#allocation7 + $0x78] sm:$0xff] }
  0x49   :  { %389 = vmatprep.subr.bf16.mxu0 %v388_v33  ;;  %412 = vmatpush3.bf16.msra.mxu1 %v411_v47  ;;  %v426_v12 = vpack.c.bf16 %v195_v11, %v194_v10  ;;  %v97_v16 = vld [vmem:[%s724_s2] sm:$0x3] }
  0x4a   :  { %413 = vmatprep.subr.bf16.mxu1 %v589_v1  ;;  %v102_v18 = vrot.slane %v97_v16, %v101_v15  ;;  %v106_v19 = vrot.slane %v97_v16, %v105_v17 }
  0x4c   :  { %391 = vmatpush1.bf16.msra.mxu0 %v390_v41 }
  0x4d   :  { %393 = vmatprep.subr.bf16.mxu0 %v392_v42  ;;  %415 = vmatpush3.bf16.msra.mxu1 %v414_v56 }
  0x4e   :  { %416 = vmatprep.subr.bf16.mxu1 %v589_v1 }
  0x50   :  { %395 = vmatpush1.bf16.msra.mxu0 %v394_v50 }
  0x51   :  { %397 = vmatprep.subr.bf16.mxu0 %v396_v51  ;;  %418 = vmatpush3.bf16.msra.mxu1 %v417_v63 }
  0x52   :  { %419 = vmatprep.subr.bf16.mxu1 %v589_v1 }
  0x54   :  { %399 = vmatpush1.bf16.msra.mxu0 %v398_v59 }
  0x55   :  { %401 = vmatprep.subr.bf16.mxu0 %v400_v60  ;;  %421 = vmatpush3.bf16.msra.mxu1 %v420_v5 }
  0x56   :  { %422 = vmatprep.subr.bf16.mxu1 %v589_v1 }
  0x58   :  { %403 = vmatpush1.bf16.msra.mxu0 %v402_v4 }
  0x59   :  { %424 = vmatpush3.bf16.msra.mxu1 %v423_v9 }
  0x5a   :  { %425 = vmatprep.subr.bf16.mxu1 %v589_v1 }
  0x5b   :  { %174 = vmatmul.mubr.f32.vlgmr.msra.gmra.mrb[0].mxu0 %v64_v8 }
  0x5d   :  { %427 = vmatpush3.bf16.msra.mxu1 %v426_v12 }
 0x12e   :  { %v175_v20 = vpop.f32.mrb[0].mxu0 }
 0x12f   :  { %v176_v21 = vadd.f32 %v175_v20, %v102_v18  ;;  %v177_v1 = vpop.f32.mrb[1].mxu0 }
 0x130   :  { %v178_v22 = vadd.f32 %v177_v1, %v106_v19 }
 0x131   :  { %273 = vst [vmem:[#allocation8] sm:$0xff] %v176_v21 }
 0x132   :  { %274 = vst [vmem:[#allocation9] sm:$0xff] %v178_v22  ;;  %370 = vmatmul.mubr.f32.vlgmr.msra.gmra.mrb[0].mxu1 %v178_v22 }
 0x133   :  { %518 = shalt.err (!%p515_p0)
}
 0x134   :  { %s519_s23 = scalar_lea.hbm %s728_s6, 128 }
 0x135   :  { %p520_p1 = scmp.ne.s32.totalorder %s728_s6, %s519_s23  ;;  %p523_p2 = scmp.lt.u32.totalorder %s519_s23, %s728_s6 }
 0x137   :  { %p525_p3 = pnand %p523_p2, %p520_p1 }
 0x139   :  { %528 = shalt.err (!%p525_p3)
}
 0x13a   :  { %295 = dma.vmem_to_hbm [thread:$0]  %s293_s18, 128, %s728_s6, [#allocation10]  }
 0x13b   :  { %s529_s29 = scalar_lea.vmem %s283_s20, 128  ;;  %p534_p5 = scmp.lt.s32.totalorder %s283_s20, %s283_s20 }
 0x13c   :  { %p530_p4 = scmp.ne.s32.totalorder %s283_s20, %s529_s29  ;;  %p535_p6 = scmp.lt.s32.totalorder %s529_s29, %s529_s29 }
 0x13e   :  { %p536_p7 = por %p535_p6, %p534_p5 }
 0x140   :  { %p537_p8 = pnand %p536_p7, %p530_p4 }
 0x142   :  { %540 = shalt.err (!%p537_p8)
}
 0x143   :  { %s541_s9 = scalar_lea.hbm %s727_s5, 128 }
 0x144   :  { %p542_p9 = scmp.ne.s32.totalorder %s727_s5, %s541_s9  ;;  %p545_p10 = scmp.lt.u32.totalorder %s541_s9, %s727_s5 }
 0x146   :  { %p547_p11 = pnand %p545_p10, %p542_p9 }
 0x148   :  { %550 = shalt.err (!%p547_p11)
}
 0x149   :  { %285 = dma.vmem_to_hbm [thread:$0]  %s283_s20, 128, %s727_s5, [#allocation4]   ;;  %v319_v0 = vld [vmem:[%s726_s4] ss:$0 sm:$0xff] }
 0x14a   :  { %s593_s3 = smov [#allocation11]  }
 0x14b   :  { %s302_s16 = sshll.u32 %s593_s3, 4  ;;  %s303_s16 = int_to_ptr.vmem [resolvable:$true] %s302_s16 }
 0x14c   :  { %s551_s17 = scalar_lea.vmem %s303_s16, 128  ;;  %p556_p13 = scmp.lt.s32.totalorder %s303_s16, %s303_s16 }
 0x14d   :  { %p552_p12 = scmp.ne.s32.totalorder %s303_s16, %s551_s17  ;;  %p557_p0 = scmp.lt.s32.totalorder %s551_s17, %s551_s17 }
 0x14f   :  { %p558_p1 = por %p557_p0, %p556_p13 }
 0x151   :  { %p559_p2 = pnand %p558_p1, %p552_p12 }
 0x205   :  { %v269_v23 = vpop.f32.mrb[0].mxu1 }
 0x206   :  { %v270_v24 = vadd.f32 %v319_v0, %v269_v23  ;;  %v371_v25 = vpop.f32.mrb[1].mxu1 }
 0x208   :  { %275 = vst [vmem:[#allocation11] sm:$0xff] %v270_v24 }
 0x209   :  { %562 = shalt.err (!%p559_p2)
}
 0x20a   :  { %s563_s19 = scalar_lea.hbm %s729_s7, 128 }
 0x20b   :  { %p564_p3 = scmp.ne.s32.totalorder %s729_s7, %s563_s19  ;;  %p567_p4 = scmp.lt.u32.totalorder %s563_s19, %s729_s7 }
 0x20d   :  { %p569_p5 = pnand %p567_p4, %p564_p3 }
 0x20f   :  { %572 = shalt.err (!%p569_p5)
}
 0x210   :  { %305 = dma.vmem_to_hbm [thread:$0]  %s303_s16, 128, %s729_s7, [#allocation10]  }
 0x211   :  { %577 = dma.done.wait [#allocation4], 128  }
 0x212   :  { %578 = vsyncadd [#allocation4], 4294967168 }
 0x213   :  { %579 = dma.done.wait [#allocation10], 256  }
 0x214   :  { %580 = vsyncadd [#allocation10], 4294967040 }
 0x215   :  { %315 = vsyncpa [#allocation3], 1 }
 0x216   :  { %316 = vsyncpa [#allocation6], 1 }
 0x217   :  { %317 = vsyncpa [#allocation4], 1 }
 0x218   :  { %318 = vsyncpa [#allocation10], 1 }

</bundles_post_ra>
